<compile_context>
chip_gen: v6e
topology: v6e:2x2x1
jax: 0.10.0
libtpu: 0.0.40
codegen_flags: <defaults>
</compile_context>

<pallas_src>
import functools
import math

import jax
import jax.numpy as jnp
from jax import lax
from jax.experimental import pallas as pl
from jax.experimental.pallas import tpu as pltpu

LN_EPS = 1e-5  # PyTorch nn.LayerNorm default


def _round_up(x, m):
    return ((x + m - 1) // m) * m


def _layernorm(h, g, b):
    mean = jnp.mean(h, axis=-1, keepdims=True)
    var = jnp.mean((h - mean) ** 2, axis=-1, keepdims=True)
    return (h - mean) * lax.rsqrt(var + LN_EPS) * g + b


def _pick_vmem_limit():
    """Per-generation scoped-VMEM limit: ~3/4 of physical VMEM, capped at 112 MiB.

    -> ~96 MiB on v5e/v6e (128 MiB physical), ~48 MiB on v7x (64 MiB per TC).
    Falls back to a conservative 32 MiB if the hardware query is unavailable.
    """
    try:
        cap = int(pltpu.get_tpu_info().vmem_capacity_bytes)
        return max(32 * 1024 * 1024, min(cap * 3 // 4, 112 * 1024 * 1024))
    except Exception:
        return 32 * 1024 * 1024


# ----------------------------------------------------------------------------
# Kernel 1: embedding projection (fc_mat2vec):  [B*T, F] @ [F, D] + b
#   - tiled over row blocks (512 rows), bf16 MXU inputs, f32 accumulate,
#     bf16 output (halves its HBM traffic and its resident block downstream).
# ----------------------------------------------------------------------------
def _embed_proj_kernel(emb_ref, w_ref, b_ref, out_ref):
    acc = (jnp.dot(emb_ref[...], w_ref[...], preferred_element_type=jnp.float32)
           + b_ref[...])
    out_ref[...] = acc.astype(out_ref.dtype)


def embed_projection(emb_flat, w, b, *, block_rows=512):
    BT, F = emb_flat.shape
    D = w.shape[1]
    rb = min(block_rows, _round_up(BT, 8))
    BT_pad = _round_up(BT, rb)
    if BT_pad != BT:
        emb_flat = jnp.pad(emb_flat, ((0, BT_pad - BT), (0, 0)))
    out = pl.pallas_call(
        _embed_proj_kernel,
        out_shape=jax.ShapeDtypeStruct((BT_pad, D), jnp.bfloat16),
        grid=(BT_pad // rb,),
        in_specs=[
            pl.BlockSpec((rb, F), lambda i: (i, 0)),
            pl.BlockSpec((F, D), lambda i: (0, 0)),
            pl.BlockSpec((1, D), lambda i: (0, 0)),
        ],
        out_specs=pl.BlockSpec((rb, D), lambda i: (i, 0)),
        compiler_params=pltpu.CompilerParams(dimension_semantics=("parallel",)),
    )(emb_flat.astype(jnp.bfloat16), w, b)
    return out if BT_pad == BT else out[:BT]


# ----------------------------------------------------------------------------
# Kernel 2: factorized Fourier positional-bias features.
#   pb[b,i,j] = sum_f a_f * cos(scale*(frac[b,j]-frac[b,i])*W_f + b_f)
#             = Phi_i[b,i,:] . Phi_j[b,j,:]
#   Phi_i = [a*cos(u) | a*sin(u)],  Phi_j = [cos(v+b) | sin(v+b)],  u=v=scale*frac*W.
#   sin is expressed as cos(x - pi/2) via pre-concatenated parameter vectors so the
#   kernel body is a single broadcast-multiply + one cos per output — O(T*2F) EUP
#   work instead of O(16*T^2), and no [B,T,T] array ever touches HBM or VMEM.
# ----------------------------------------------------------------------------
def _fourier_feat_kernel(frac_ref, w2_ref, phi_ph_i_ref, phi_ph_j_ref, a2_ref,
                         phi_i_ref, phi_j_ref, *, scale):
    u = (frac_ref[0] * scale) * w2_ref[...]                       # [T, 2F]
    phi_i_ref[0] = (a2_ref[...] * jnp.cos(u + phi_ph_i_ref[...])).astype(phi_i_ref.dtype)
    phi_j_ref[0] = jnp.cos(u + phi_ph_j_ref[...]).astype(phi_j_ref.dtype)


def fourier_features(frac, fW, fb, fa, scale):
    B, T = frac.shape
    nf = fW.shape[-1]
    nf2 = 2 * nf
    half_pi = jnp.float32(math.pi / 2.0)
    # Extended parameter vectors built once in the wrapper (tiny XLA glue):
    w2 = jnp.concatenate([fW, fW], axis=-1)                                   # [1, 2F]
    a2 = jnp.concatenate([fa, fa], axis=-1)                                   # [1, 2F]
    ph_i = jnp.concatenate([jnp.zeros_like(fW), jnp.full_like(fW, -half_pi)], axis=-1)
    ph_j = jnp.concatenate([fb, fb - half_pi], axis=-1)
    frac3 = frac[:, :, None]                                                  # [B, T, 1]
    kern = functools.partial(_fourier_feat_kernel, scale=float(scale))
    return pl.pallas_call(
        kern,
        out_shape=(jax.ShapeDtypeStruct((B, T, nf2), jnp.bfloat16),
                   jax.ShapeDtypeStruct((B, T, nf2), jnp.bfloat16)),
        grid=(B,),
        in_specs=[
            pl.BlockSpec((1, T, 1), lambda b: (b, 0, 0)),
            pl.BlockSpec((1, nf2), lambda b: (0, 0)),
            pl.BlockSpec((1, nf2), lambda b: (0, 0)),
            pl.BlockSpec((1, nf2), lambda b: (0, 0)),
            pl.BlockSpec((1, nf2), lambda b: (0, 0)),
        ],
        out_specs=(pl.BlockSpec((1, T, nf2), lambda b: (b, 0, 0)),
                   pl.BlockSpec((1, T, nf2), lambda b: (b, 0, 0))),
        compiler_params=pltpu.CompilerParams(dimension_semantics=("parallel",)),
    )(frac3, w2, ph_i, ph_j, a2)


# ----------------------------------------------------------------------------
# Kernel 3: ALL FourierMoETransformerLayers fused into one pallas_call.
#   grid = (batch_block ["parallel"], layer ["arbitrary"], expert ["arbitrary"])
#   The residual stream x stays resident in the output VMEM block across the
#   layer / expert axes; per-layer weights stream via BlockSpecs and expert
#   W1/W2 stream one expert per grid step.
# ----------------------------------------------------------------------------
def _fused_layers_kernel(
    x0_ref, phi_i_ref, phi_j_ref,
    wkv_ref, bkv_ref, wo_ref, bo_ref, ln1g_ref, ln1b_ref,
    wg_ref, bg_ref, w1_ref, b1_ref, w2_ref, b2_ref, ln2g_ref, ln2b_ref,
    out_ref,
    x1_scr, x1b_scr, moe_scr, gate_scr,
    *, num_experts,
):
    l = pl.program_id(1)
    e = pl.program_id(2)
    bb, T, D = out_ref.shape
    R = bb * T
    E = num_experts

    # Seed the resident residual stream with the (bf16) embedding output.
    @pl.when(jnp.logical_and(l == 0, e == 0))
    def _():
        out_ref[...] = x0_ref[...].astype(jnp.float32)

    # --- per-layer prologue (runs once per layer): attention + LN1 + gating ---
    @pl.when(e == 0)
    def _():
        x = out_ref[...].reshape(R, D)                      # fold batch into rows
        xb = x.astype(jnp.bfloat16)

        # fused K/V projection: [R, 2D]
        kv = jnp.dot(xb, wkv_ref[0], preferred_element_type=jnp.float32) + bkv_ref[0]
        K = kv[:, :D]
        V = kv[:, D:]

        # PyTorch Fourier attention is head-independent in the flat [T, D] layout:
        #   wv[b,i,d] = sum_j K[b,j,d]*V[b,j,d] + sum_j pb[b,i,j]*V[b,j,d]
        # The first term is an XLU token-reduce (MXU stays free for the matmuls);
        # the second uses the factorized bias: pb@V = Phi_i @ (Phi_j^T @ V).
        s = jnp.sum((K * V).reshape(bb, T, D), axis=1, keepdims=True)   # [bb, 1, D]
        V3b = V.reshape(bb, T, D).astype(jnp.bfloat16)
        tmp = jnp.einsum('btf,btd->bfd', phi_j_ref[...], V3b,
                         preferred_element_type=jnp.float32)            # [bb, 2F, D]
        pbv = jnp.einsum('btf,bfd->btd', phi_i_ref[...],
                         tmp.astype(jnp.bfloat16),
                         preferred_element_type=jnp.float32)            # [bb, T, D]
        wv = (s + pbv).reshape(R, D)

        out_attn = (jnp.dot(wv.astype(jnp.bfloat16), wo_ref[0],
                            preferred_element_type=jnp.float32) + bo_ref[0])
        x1 = _layernorm(x + out_attn, ln1g_ref[0], ln1b_ref[0])   # dropout = identity
        x1b = x1.astype(jnp.bfloat16)
        x1_scr[...] = x1                                          # f32 residual path
        x1b_scr[...] = x1b                                        # bf16 MXU feed

        # top-2 gating: softmax over experts, un-renormalized top-2 weights
        # (matches torch: topk of the full-E softmax, no renorm, eval => no noise).
        logits = (jnp.dot(x1b, wg_ref[0], preferred_element_type=jnp.float32)
                  + bg_ref[0])
        logits = logits - jnp.max(logits, axis=-1, keepdims=True)
        expd = jnp.exp(logits)
        scores = expd / jnp.sum(expd, axis=-1, keepdims=True)     # [R, E]
        idx = lax.broadcasted_iota(jnp.int32, (R, E), 1)
        top1_val = jnp.max(scores, axis=-1, keepdims=True)
        top1_idx = jnp.min(jnp.where(scores == top1_val, idx, E), axis=-1,
                           keepdims=True)
        masked = jnp.where(idx == top1_idx, -jnp.inf, scores)
        top2_val = jnp.max(masked, axis=-1, keepdims=True)
        top2_idx = jnp.min(jnp.where(masked == top2_val, idx, E), axis=-1,
                           keepdims=True)
        for k in range(E):                                        # static unroll, small E
            gate_scr[k] = (jnp.where(top1_idx == k, top1_val, 0.0)
                           + jnp.where(top2_idx == k, top2_val, 0.0))

    # --- expert e (every grid step): dense FFN, gate-weighted accumulate ------
    x1b = x1b_scr[...]                                            # bf16, written once/layer
    h = jnp.dot(x1b, w1_ref[0, 0], preferred_element_type=jnp.float32) + b1_ref[0, 0]
    h = jnp.maximum(h, 0.0)                                       # ReLU (expert dropouts = id)
    o = (jnp.dot(h.astype(jnp.bfloat16), w2_ref[0, 0],
                 preferred_element_type=jnp.float32) + b2_ref[0, 0])
    contrib = gate_scr[e] * o                                     # [R,1] * [R,D]

    @pl.when(e == 0)
    def _():
        moe_scr[...] = contrib

    @pl.when(e > 0)
    def _():
        moe_scr[...] = moe_scr[...] + contrib

    # --- per-layer epilogue: residual + LN2 back into the resident stream -----
    @pl.when(e == E - 1)
    def _():
        x2 = _layernorm(x1_scr[...] + moe_scr[...], ln2g_ref[0], ln2b_ref[0])
        out_ref[...] = x2.reshape(bb, T, D)


def _pick_batch_block(B, T, D, E, nf2, Fh, vmem_limit, target_rows=1024):
    """Pick the batch block so R = bb*T reaches ~target_rows within the VMEM budget,
    preferring >=2 batch blocks (when R stays >=256) so the parallel axis can
    shard across v7x's two TensorCores."""
    # Double-buffered bf16 streamed weights (independent of bb) + slop.
    fixed = 4 * (3 * D * D + D * E + 2 * D * Fh) + (1 << 20)
    budget = int(vmem_limit * 0.8) - fixed
    # Rough per-row VMEM cost: resident out block, x0, phi (double-buffered),
    # scratches, gate scratch (lane-padded) and f32 prologue temporaries.
    per_row = (D * 8 + D * 4 + 8 * nf2
               + D * 4 + D * 2 + D * 4 + E * 512
               + 32 * D)
    divs = [d for d in range(1, B + 1) if B % d == 0]
    fits = [d for d in divs if d * T * per_row <= budget] or [1]
    reach = [d for d in fits if d * T >= target_rows]
    bb = reach[0] if reach else fits[-1]
    if bb == B and B > 1:
        smaller = [d for d in fits if d < B and d * T >= min(target_rows, 256)]
        if smaller:
            bb = smaller[-1]
    return bb


def encoder_layers(x0, phi_i, phi_j, lp, *, num_experts):
    B, T, D = x0.shape
    N = lp["wkv"].shape[0]
    E = num_experts
    Fh = lp["w1"].shape[-1]
    nf2 = phi_i.shape[-1]
    vmem_limit = _pick_vmem_limit()
    bb = _pick_batch_block(B, T, D, E, nf2, Fh, vmem_limit)
    R = bb * T

    xmap = lambda rb, l, e: (rb, 0, 0)         # per-batch-block activations
    wmap = lambda rb, l, e: (l, 0, 0)          # per-layer weights
    emap = lambda rb, l, e: (l, e, 0, 0)       # per-layer, per-expert weights

    in_specs = [
        pl.BlockSpec((bb, T, D), xmap),        # x0 (bf16 embed output)
        pl.BlockSpec((bb, T, nf2), xmap),      # Phi_i (factorized bias, i-side)
        pl.BlockSpec((bb, T, nf2), xmap),      # Phi_j (factorized bias, j-side)
        pl.BlockSpec((1, D, 2 * D), wmap),     # fused K/V weight
        pl.BlockSpec((1, 1, 2 * D), wmap),     # fused K/V bias
        pl.BlockSpec((1, D, D), wmap),         # output weight
        pl.BlockSpec((1, 1, D), wmap),         # output bias
        pl.BlockSpec((1, 1, D), wmap),         # norm_attn gamma
        pl.BlockSpec((1, 1, D), wmap),         # norm_attn beta
        pl.BlockSpec((1, D, E), wmap),         # gate weight
        pl.BlockSpec((1, 1, E), wmap),         # gate bias
        pl.BlockSpec((1, 1, D, Fh), emap),     # expert layer-1 weight (streamed)
        pl.BlockSpec((1, 1, 1, Fh), emap),     # expert layer-1 bias
        pl.BlockSpec((1, 1, Fh, D), emap),     # expert layer-2 weight (streamed)
        pl.BlockSpec((1, 1, 1, D), emap),      # expert layer-2 bias
        pl.BlockSpec((1, 1, D), wmap),         # norm_ff gamma
        pl.BlockSpec((1, 1, D), wmap),         # norm_ff beta
    ]
    kern = functools.partial(_fused_layers_kernel, num_experts=E)
    return pl.pallas_call(
        kern,
        out_shape=jax.ShapeDtypeStruct((B, T, D), jnp.float32),
        grid=(B // bb, N, E),
        in_specs=in_specs,
        out_specs=pl.BlockSpec((bb, T, D), xmap),
        scratch_shapes=[
            pltpu.VMEM((R, D), jnp.float32),    # x1 (f32, residual + LN2 path)
            pltpu.VMEM((R, D), jnp.bfloat16),   # x1 bf16 copy (expert MXU feed)
            pltpu.VMEM((R, D), jnp.float32),    # MoE accumulator
            pltpu.VMEM((E, R, 1), jnp.float32), # per-expert routing weights
        ],
        compiler_params=pltpu.CompilerParams(
            dimension_semantics=("parallel", "arbitrary", "arbitrary"),
            vmem_limit_bytes=vmem_limit,
        ),
    )(
        x0, phi_i, phi_j,
        lp["wkv"], lp["bkv"], lp["wo"], lp["bo"], lp["ln1g"], lp["ln1b"],
        lp["wg"], lp["bg"], lp["w1"], lp["b1"], lp["w2"], lp["b2"],
        lp["ln2g"], lp["ln2b"],
    )


# ----------------------------------------------------------------------------
# Encoder forward (glue + kernel calls)
# ----------------------------------------------------------------------------
def encoder_forward(src, frac, params):
    # Embedding lookup stays as an XLA gather (glue); projection is a Pallas kernel.
    emb = jnp.take(params["cbfv"], src, axis=0)               # [B, T, feat]
    B, T, F = emb.shape
    x0 = embed_projection(emb.reshape(B * T, F), params["wm"], params["bm"])
    x0 = x0.reshape(B, T, -1)                                 # bf16 [B, T, D]

    phi_i, phi_j = fourier_features(
        frac, params["fW"], params["fb"], params["fa"], params["fscale"]
    )

    # All N layers fused in one pallas_call (x never leaves VMEM between layers).
    return encoder_layers(x0, phi_i, phi_j, params["layers"],
                          num_experts=params["num_experts"])


# ----------------------------------------------------------------------------
# Deterministic parameter initialization (shapes follow the module __init__;
# per-layer weights are stacked on a leading layer axis, K/V fused to [D, 2D],
# matmul weights stored in bfloat16).
# ----------------------------------------------------------------------------
def init_params(key, *, d_model, N, heads, dim_feedforward, num_experts,
                feat_size, n_elements, num_fourier_features=16, fourier_scale=10.0):
    assert d_model % heads == 0
    D, E, Fh = d_model, num_experts, dim_feedforward
    keys = iter(jax.random.split(key, 16))
    nk = lambda: next(keys)

    params = {"num_experts": E}
    # Embedder (synthetic mat2vec table; row 0 is the zero/pad row)
    cbfv = jax.random.normal(nk(), (n_elements, feat_size), jnp.float32)
    params["cbfv"] = jnp.concatenate([jnp.zeros((1, feat_size), jnp.float32), cbfv], 0)
    params["wm"] = (jax.random.normal(nk(), (feat_size, D)) * 0.1).astype(jnp.bfloat16)
    params["bm"] = (jax.random.normal(nk(), (1, D)) * 0.01).astype(jnp.float32)

    # FourierPositionalBias parameters (kept as [1, F] rows)
    params["fW"] = (jax.random.normal(nk(), (1, num_fourier_features)) * 0.1).astype(jnp.float32)
    params["fb"] = (jax.random.uniform(nk(), (1, num_fourier_features)) * 2.0 * math.pi).astype(jnp.float32)
    params["fa"] = jax.random.normal(nk(), (1, num_fourier_features)).astype(jnp.float32)
    params["fscale"] = fourier_scale

    def stack(shape, scale=0.1, dtype=jnp.bfloat16):
        return (jax.random.normal(nk(), (N,) + shape) * scale).astype(dtype)

    params["layers"] = {
        "wkv": stack((D, 2 * D)),                              # fused key/value weights
        "bkv": jnp.zeros((N, 1, 2 * D), jnp.float32),
        "wo": stack((D, D)),
        "bo": jnp.zeros((N, 1, D), jnp.float32),
        "ln1g": jnp.ones((N, 1, D), jnp.float32),
        "ln1b": jnp.zeros((N, 1, D), jnp.float32),
        "wg": stack((D, E)),
        "bg": jnp.zeros((N, 1, E), jnp.float32),
        "w1": stack((E, D, Fh)),
        "b1": jnp.zeros((N, E, 1, Fh), jnp.float32),
        "w2": stack((E, Fh, D)),
        "b2": jnp.zeros((N, E, 1, D), jnp.float32),
        "ln2g": jnp.ones((N, 1, D), jnp.float32),
        "ln2b": jnp.zeros((N, 1, D), jnp.float32),
    }
    return params
    # TODO(synk): optional int8 (v5e/v6e) / fp8 (v7x) expert-weight streaming and
    # 256-aligned Fh padding are left out; they only pay off once profiles show the
    # MoE stage is still HBM-bound after the larger R chosen above.


if __name__ == "__main__":
    # Small shapes consistent with the module
    B, T = 2, 8
    d_model, N, heads = 32, 2, 4
    dim_feedforward, num_experts = 64, 4
    feat_size, n_elements = 24, 10

    key = jax.random.PRNGKey(0)
    kp, ks, kf = jax.random.split(key, 3)

    params = init_params(
        kp, d_model=d_model, N=N, heads=heads, dim_feedforward=dim_feedforward,
        num_experts=num_experts, feat_size=feat_size, n_elements=n_elements,
    )

    src = jax.random.randint(ks, (B, T), 1, n_elements + 1, dtype=jnp.int32)  # element ids
    frac = jax.random.uniform(kf, (B, T), jnp.float32)                        # fractions

    out = encoder_forward(src, frac, params)
    out = jax.block_until_ready(out)
    assert out.shape == (B, T, d_model) and out.dtype == jnp.float32
    assert bool(jnp.all(jnp.isfinite(out)))
    print("KERNEL_OK")
</pallas_src>

<mosaic_0001>
module attributes {stable_mosaic.version = 11 : i64} {
  func.func @_embed_proj_kernel(%arg0: i32, %arg1: memref<16x24xbf16, #tpu.memory_space<vmem>>, %arg2: memref<24x32xbf16, #tpu.memory_space<vmem>>, %arg3: memref<1x32xf32, #tpu.memory_space<vmem>>, %arg4: memref<16x32xbf16, #tpu.memory_space<vmem>>) attributes {dimension_semantics = [#tpu.dimension_semantics<parallel>], iteration_bounds = array<i64: 1>, scalar_prefetch = 0 : i64, scratch_operands = 0 : i64, tpu.core_type = #tpu.core_type<tc>, window_params = [{transform_indices = @transform_0, window_bounds = array<i64: 16, 24>}, {pipeline_mode = #tpu.pipeline_mode<synchronous>, transform_indices = @transform_1, window_bounds = array<i64: 24, 32>}, {pipeline_mode = #tpu.pipeline_mode<synchronous>, transform_indices = @transform_2, window_bounds = array<i64: 1, 32>}, {transform_indices = @transform_3, window_bounds = array<i64: 16, 32>}]} {
    %c0 = arith.constant 0 : index
    %c0_0 = arith.constant 0 : index
    %0 = vector.load %arg1[%c0, %c0_0] : memref<16x24xbf16, #tpu.memory_space<vmem>>, vector<16x24xbf16>
    %c0_1 = arith.constant 0 : index
    %c0_2 = arith.constant 0 : index
    %1 = vector.load %arg2[%c0_1, %c0_2] : memref<24x32xbf16, #tpu.memory_space<vmem>>, vector<24x32xbf16>
    %cst = arith.constant dense<0.000000e+00> : vector<16x32xf32>
    %2 = tpu.matmul %0, %1, %cst {dimension_numbers = #tpu.dot_dimension_numbers<[1], [0], [0], [1], [0, 0, 1, 1], [], []>} : vector<16x24xbf16>, vector<24x32xbf16>, vector<16x32xf32> -> vector<16x32xf32>
    %c0_3 = arith.constant 0 : index
    %c0_4 = arith.constant 0 : index
    %3 = vector.load %arg3[%c0_3, %c0_4] : memref<1x32xf32, #tpu.memory_space<vmem>>, vector<1x32xf32>
    %4 = vector.broadcast %3 : vector<1x32xf32> to vector<16x32xf32>
    %5 = arith.addf %2, %4 : vector<16x32xf32>
    %6 = arith.truncf %5 : vector<16x32xf32> to vector<16x32xbf16>
    %c0_5 = arith.constant 0 : index
    %c0_6 = arith.constant 0 : index
    %7 = vector.load %arg4[%c0_5, %c0_6] : memref<16x32xbf16, #tpu.memory_space<vmem>>, vector<16x32xbf16>
    tpu.vector_store %arg4[%c0_5, %c0_6], %6 {strides = array<i32>} : memref<16x32xbf16, #tpu.memory_space<vmem>>, vector<16x32xbf16>,
    return
  }
  func.func @transform_0(%arg0: i32) -> (i32, i32) {
    %c0_i32 = arith.constant 0 : i32
    %c0_i32_0 = arith.constant 0 : i32
    return %arg0, %c0_i32 : i32, i32
  }
  func.func @transform_1(%arg0: i32) -> (i32, i32) {
    %c0_i32 = arith.constant 0 : i32
    %c0_i32_0 = arith.constant 0 : i32
    %c0_i32_1 = arith.constant 0 : i32
    return %c0_i32, %c0_i32_0 : i32, i32
  }
  func.func @transform_2(%arg0: i32) -> (i32, i32) {
    %c0_i32 = arith.constant 0 : i32
    %c0_i32_0 = arith.constant 0 : i32
    %c0_i32_1 = arith.constant 0 : i32
    return %c0_i32, %c0_i32_0 : i32, i32
  }
  func.func @transform_3(%arg0: i32) -> (i32, i32) {
    %c0_i32 = arith.constant 0 : i32
    %c0_i32_0 = arith.constant 0 : i32
    return %arg0, %c0_i32 : i32, i32
  }
}

</mosaic_0001>

<bundles_post_ra>
// kernel: tpu_custom_call.1
= control target key start
LH: loop header
LB: loop body
LE: loop exit
PB: predicated region body
PF: predicated region fallthrough
CT: control target
= control target key end

     0   :  { %8 = vsyncpa [#allocation3], 0  ;;  %s292_s0 = inlined_call_operand.hbm [shape: bf16[16,24], index: 0, kind: input, shape index: {}]   ;;  %s293_s1 = inlined_call_operand.hbm [shape: bf16[24,32], index: 1, kind: input, shape index: {}]   ;;  %s294_s2 = inlined_call_operand.vmem [shape: f32[1,32], index: 2, kind: input, shape index: {}]   ;;  %s295_s3 = inlined_call_operand.hbm [shape: bf16[16,32], index: 3, kind: output, shape index: {}]  }
   0x1   :  { %9 = vsyncpa [#allocation6], 0 }
   0x2   :  { %10 = vsyncpa [#allocation4], 0  ;;  %s244_s12 = smov [#allocation2]  }
   0x3   :  { %s16_s13 = sshll.u32 %s244_s12, 4  ;;  %s17_s13 = int_to_ptr.vmem [resolvable:$true] %s16_s13 }
   0x4   :  { %s186_s14 = scalar_lea.vmem %s17_s13, 128  ;;  %p191_p1 = scmp.lt.s32.totalorder %s17_s13, %s17_s13 }
   0x5   :  { %p187_p0 = scmp.ne.s32.totalorder %s17_s13, %s186_s14  ;;  %p192_p2 = scmp.lt.s32.totalorder %s186_s14, %s186_s14 }
   0x7   :  { %p193_p3 = por %p192_p2, %p191_p1 }
   0x9   :  { %p194_p4 = pnand %p193_p3, %p187_p0 }
   0xb   :  { %197 = shalt.err (!%p194_p4)
}
   0xc   :  { %s245_s15 = smov 64   ;;  %s246_s16 = smov 4  }
   0xd   :  { %22 = dma.hbm_to_vmem [thread:$0]  %s292_s0, 128, %s17_s13, [#allocation3], %s245_s15, %s245_s15, %s246_s16  }
   0xe   :  { %s247_s19 = smov [#allocation5]  }
   0xf   :  { %s28_s20 = sshll.u32 %s247_s19, 4  ;;  %s29_s20 = int_to_ptr.vmem [resolvable:$true] %s28_s20 }
  0x10   :  { %s206_s21 = scalar_lea.vmem %s29_s20, 192  ;;  %p211_p6 = scmp.lt.s32.totalorder %s29_s20, %s29_s20 }
  0x11   :  { %p207_p5 = scmp.ne.s32.totalorder %s29_s20, %s206_s21  ;;  %p212_p7 = scmp.lt.s32.totalorder %s206_s21, %s206_s21 }
  0x13   :  { %p213_p8 = por %p212_p7, %p211_p6 }
  0x15   :  { %p214_p9 = pnand %p213_p8, %p207_p5 }
  0x17   :  { %217 = shalt.err (!%p214_p9)
}
  0x18   :  { %34 = dma.hbm_to_vmem [thread:$0]  %s293_s1, 192, %s29_s20, [#allocation6], %s245_s15, %s245_s15, %s246_s16  }
  0x19   :  { %238 = dma.done.wait [#allocation3], 128  }
  0x1a   :  { %239 = vsyncadd [#allocation3], 4294967168 }
  0x1b   :  { %240 = dma.done.wait [#allocation6], 192  }
  0x1c   :  { %241 = vsyncadd [#allocation6], 4294967104  ;;  %v248_v0 = vmov 0.0   ;;  %vm249_vm0 = vmmov 0   ;;  %vm74_vm1 = vcmask 1043456   ;;  %v176_v3 = vld [vmem:[#allocation5] sm:$0xff]  }
  0x1d   :  { %160 = vmatprep.subr.bf16.mxu0 %v248_v0  ;;  %164 = vmatprep.mubr.msk.bf16.mxu0 %vm249_vm0, %v248_v0  ;;  %v175_v1 = vld [vmem:[#allocation5 + $0x8] ss:$0 sps:$4 sm:$0xff]   ;;  %v177_v4 = vld [vmem:[#allocation2] sm:$0xff]   ;;  %vm70_vm2 = vcmask 195584   ;;  %vm127_vm3 = vcmask 257024   ;;  %s250_s24 = smov [#allocation7]  }
  0x1e   :  { %v76_v2 = vsel %vm74_vm1, %v175_v1, 0  ;;  %v148_v5 = vld [vmem:[%s294_s2] ss:$0 sm:$0xff]  ;;  %s135_s25 = sshll.u32 %s250_s24, 4  ;;  %s136_s25 = int_to_ptr.vmem [resolvable:$true] %s135_s25 }
  0x1f   :  { %161 = vmatpush3.bf16.msra.mxu0 %v76_v2  ;;  %s218_s26 = scalar_lea.vmem %s136_s25, 128  ;;  %p223_p11 = scmp.lt.s32.totalorder %s136_s25, %s136_s25 }
  0x20   :  { %162 = vmatprep.subr.bf16.mxu0 %v248_v0  ;;  %p219_p10 = scmp.ne.s32.totalorder %s136_s25, %s218_s26  ;;  %p224_p12 = scmp.lt.s32.totalorder %s218_s26, %s218_s26 }
  0x22   :  { %p225_p13 = por %p224_p12, %p223_p11 }
  0x23   :  { %163 = vmatpush3.bf16.msra.mxu0 %v176_v3 }
  0x24   :  { %p226_p0 = pnand %p225_p13, %p219_p10 }
  0x26   :  { %165 = vmatmul.mubr.msk.bf16.vlgmr.msra.gmra.mxu0 %vm70_vm2, %v177_v4 }
  0xe6   :  { %v112_v6 = vpop.f32.mrf.mxu0 }
  0xe7   :  { %v113_v7 = vadd.f32 %v148_v5, %v112_v6 }
  0xe8   :  { %v166_v8 = vpop.f32.mrf.mxu0 }
  0xe9   :  { %v155_v9 = vpack.c.bf16 %v113_v7, %v113_v7 }
  0xea   :  { %v115_v10 = vpop.f32.mrf.mxu0 }
  0xeb   :  { %v116_v11 = vadd.f32 %v148_v5, %v115_v10  ;;  %128 = vst.msk [vmem:[#allocation7] sm:$0xf] %vm127_vm3, %v155_v9 }
  0xec   :  { %v167_v12 = vpop.f32.mrf.mxu0 }
  0xed   :  { %v156_v13 = vpack.c.bf16 %v116_v11, %v116_v11 }
  0xef   :  { %129 = vst.msk [vmem:[#allocation7 + $0x4] sm:$0xf] %vm127_vm3, %v156_v13 }
  0xf0   :  { %229 = shalt.err (!%p226_p0)
}
  0xf1   :  { %141 = dma.vmem_to_hbm [thread:$0]  %s136_s25, 128, %s295_s3, [#allocation4], %s245_s15, %s245_s15, %s246_s16  }
  0xf2   :  { %242 = dma.done.wait [#allocation4], 128  }
  0xf3   :  { %243 = vsyncadd [#allocation4], 4294967168 }
  0xf4   :  { %145 = vsyncpa [#allocation3], 1 }
  0xf5   :  { %146 = vsyncpa [#allocation6], 1 }
  0xf6   :  { %147 = vsyncpa [#allocation4], 1 }

</bundles_post_ra>
